<compile_context>
chip_gen: v6e
topology: v6e:2x2x1
jax: 0.10.0
libtpu: 0.0.40
codegen_flags: <defaults>
</compile_context>

<pallas_src>
import math

import jax
import jax.numpy as jnp
from jax import lax
from jax.experimental import pallas as pl
from jax.experimental.pallas import tpu as pltpu

# ----------------------------- configuration -------------------------------
B = 8          # batch
S = 8          # sequence length
V = 32         # vocab size of the stand-in encoder
H = 16         # "hidden_size" of the stand-in encoder
L = 4          # args.lebel_dim (number of labels)
D = 2 * H      # hidden_size * 2 (feature dim seen by the classifier head)

S_SCALE = 1.0      # self.s
MARGIN = 0.35      # args.m
COS_EPS = 1e-8     # cosine_sim clamp eps
BN_EPS = 1e-5      # nn.BatchNorm1d default eps

OUT_W = 128                       # lane-dense output slab width
OFF_LOGITS, OFF_REV, OFF_OUT = 0, 8, 32     # slab layout (lane-aligned offsets)
OFF_IP, OFF_H = 0, 32                        # column layout of the fused head weight


# ------------------------------ fused kernel ---------------------------------
def fused_forward_kernel(ids_ref, tt_ref, att_ref, lbl_ref,            # [B,S]/[B,1] VMEM
                         tok_emb_ref, seg_emb_ref, wp_ref, bp_ref,     # encoder params
                         whead_ref, wnorm_ref,                         # fused head weight / row norms
                         gamma_ref, beta_ref, w2_ref, b2_ref,          # discriminator
                         out_ref):                                     # [B, 128] slab
    # ---------- stand-in encoder: one-hot/MXU embedding + masked mean pool ---
    # TODO(synk): the reference uses a pretrained HuggingFace BERT encoder;
    # only its pooler-output contract is reproduced here.
    ids = ids_ref[...]                               # [B, S] int32
    tts = tt_ref[...]                                # [B, S] int32
    mask = att_ref[...]                              # [B, S] float32

    lane_v = lax.broadcasted_iota(jnp.int32, (B, V), 1)    # [B, V]
    lane_s = lax.broadcasted_iota(jnp.int32, (B, 2), 1)    # [B, 2]
    tok_cnt = jnp.zeros((B, V), jnp.float32)               # C[b, v]
    seg_cnt = jnp.zeros((B, 2), jnp.float32)               # Cs[b, segment]
    for s in range(S):                                     # static, all-vector per step
        m_s = mask[:, s:s + 1]                             # [B, 1]
        tok_cnt = tok_cnt + m_s * (ids[:, s:s + 1] == lane_v).astype(jnp.float32)
        seg_cnt = seg_cnt + m_s * (tts[:, s:s + 1] == lane_s).astype(jnp.float32)
    cnt = jnp.sum(mask, axis=1, keepdims=True)             # [B, 1]

    pooled_sum = (jnp.dot(tok_cnt, tok_emb_ref[...], preferred_element_type=jnp.float32)
                  + jnp.dot(seg_cnt, seg_emb_ref[...], preferred_element_type=jnp.float32))
    pooled_in = pooled_sum / jnp.maximum(cnt, 1.0)                      # [B, H]
    pooled = jnp.tanh(
        jnp.dot(pooled_in, wp_ref[...], preferred_element_type=jnp.float32)
        + bp_ref[...])                                                  # [B, H]

    # ---------- fused head matmul: [B,H] @ [H,128] -> ip | h -----------------
    # (repeat(1,2) is folded into the weight columns at init time.)
    head = jnp.dot(pooled, whead_ref[...], preferred_element_type=jnp.float32)  # [B, 128]
    ip = head[:, OFF_IP:OFF_IP + L]                                     # outputs @ weight.T
    h = head[:, OFF_H:OFF_H + D]                                        # discriminator Linear1

    # ---------- discriminator: BN(batch stats) -> ReLU -> Linear --------------
    # (ReverseLayerF forward is identity; b1 omitted: a Linear bias cancels
    #  exactly under training-mode BatchNorm.)
    mu = jnp.mean(h, axis=0, keepdims=True)
    var = jnp.mean((h - mu) ** 2, axis=0, keepdims=True)                # biased var (torch BN)
    hn = (h - mu) * lax.rsqrt(var + BN_EPS) * gamma_ref[...] + beta_ref[...]
    hr = jnp.maximum(hn, 0.0)
    logits_rev = (jnp.dot(hr, w2_ref[...], preferred_element_type=jnp.float32)
                  + b2_ref[...])                                        # [B, 2]

    # ---------- cosine-margin classifier (module's mm/norm/clamp math) --------
    xn = jnp.sqrt(2.0 * jnp.sum(pooled * pooled, axis=-1, keepdims=True))   # ||outputs||, [B,1]
    cos = ip / jnp.maximum(xn * wnorm_ref[...], COS_EPS)                # [B, L]
    one_hot = (lax.broadcasted_iota(jnp.int32, (B, L), 1)
               == lbl_ref[...]).astype(jnp.float32)                     # [B, L]; label<0 -> zeros
    logits = S_SCALE * (cos - one_hot * MARGIN)                         # [B, L]

    # self.norm(outputs) in the reference only mutates BN running statistics;
    # its return value is discarded, so it does not affect any output.

    # ---------- lane-aligned slab writes (no last-axis concatenation) ---------
    out_ref[...] = jnp.zeros((B, OUT_W), jnp.float32)
    out_ref[:, OFF_LOGITS:OFF_LOGITS + L] = logits
    out_ref[:, OFF_REV:OFF_REV + 2] = logits_rev
    out_ref[:, OFF_OUT:OFF_OUT + H] = pooled        # outputs = [pooled, pooled]
    out_ref[:, OFF_OUT + H:OFF_OUT + D] = pooled


# -------------------------------- wrapper -------------------------------------
def _fused_call(prep, input_ids, token_type_ids, attention_mask_f32, label_i32):
    vmem = pl.BlockSpec(memory_space=pltpu.MemorySpace.VMEM)
    return pl.pallas_call(
        fused_forward_kernel,
        out_shape=jax.ShapeDtypeStruct((B, OUT_W), jnp.float32),
        in_specs=[vmem] * 14,
        out_specs=vmem,
    )(input_ids, token_type_ids, attention_mask_f32, label_i32,
      prep["tok_emb"], prep["seg_emb"], prep["wp"], prep["bp"],
      prep["whead"], prep["wnorm"],
      prep["gamma"], prep["beta"], prep["w2"], prep["b2"])


def my_igd_forward(prep, input_ids, token_type_ids, attention_mask,
                   label=None, alpha=None):
    att_f = attention_mask.astype(jnp.float32)
    if label is None:
        lbl = jnp.full((input_ids.shape[0], 1), -1, jnp.int32)   # zero one-hot (s == 1.0)
    else:
        lbl = label.astype(jnp.int32).reshape(-1, 1)
    slab = _fused_call(prep, input_ids.astype(jnp.int32),
                       token_type_ids.astype(jnp.int32), att_f, lbl)
    logits = slab[:, OFF_LOGITS:OFF_LOGITS + L]
    outputs = slab[:, OFF_OUT:OFF_OUT + D]
    logits_revers = slab[:, OFF_REV:OFF_REV + 2] if alpha is not None else None
    return logits, outputs, logits_revers


# --------------------------- parameter init -----------------------------------
def init_raw_params(key):
    ks = jax.random.split(key, 8)
    tok_emb = jax.random.normal(ks[0], (V, H), jnp.float32) * 0.02
    seg_emb = jax.random.normal(ks[1], (2, H), jnp.float32) * 0.02
    wp = jax.random.normal(ks[2], (H, H), jnp.float32) * 0.02          # [in, out]
    bp = jnp.zeros((1, H), jnp.float32)
    bound = math.sqrt(6.0 / (L + D))                                    # xavier_uniform_
    weight = jax.random.uniform(ks[3], (L, D), jnp.float32, -bound, bound)
    lim1 = 1.0 / math.sqrt(D)
    w1 = jax.random.uniform(ks[4], (D, D), jnp.float32, -lim1, lim1)    # [in, out]
    b1 = jax.random.uniform(ks[5], (1, D), jnp.float32, -lim1, lim1)
    gamma = jnp.ones((1, D), jnp.float32)
    beta = jnp.zeros((1, D), jnp.float32)
    w2 = jax.random.uniform(ks[6], (D, 2), jnp.float32, -lim1, lim1)    # [in, out]
    b2 = jax.random.uniform(ks[7], (1, 2), jnp.float32, -lim1, lim1)
    return dict(tok_emb=tok_emb, seg_emb=seg_emb, wp=wp, bp=bp, weight=weight,
                w1=w1, b1=b1, gamma=gamma, beta=beta, w2=w2, b2=b2)


def prepare_params(raw):
    """One-time parameter transform:
       * fold repeat(1,2) into the head weights (x @ W == pooled @ (W[:H]+W[H:])),
       * pack the classifier weight and the discriminator's first Linear into a
         single lane-aligned [H, 128] head weight (ip @ col 0, h @ col 32),
       * pre-compute the classifier row norms,
       * keep embedding tables as (V, H)/(2, H) for the one-hot MXU gather."""
    wt = raw["weight"].T                                                # [D, L]
    wcls = wt[:H] + wt[H:]                                              # [H, L]
    w1f = raw["w1"][:H] + raw["w1"][H:]                                 # [H, D]; b1 cancels in BN
    whead = jnp.zeros((H, OUT_W), jnp.float32)
    whead = whead.at[:, OFF_IP:OFF_IP + L].set(wcls)
    whead = whead.at[:, OFF_H:OFF_H + D].set(w1f)
    return dict(
        tok_emb=raw["tok_emb"], seg_emb=raw["seg_emb"],
        wp=raw["wp"], bp=raw["bp"],
        whead=whead,                                                    # [H, 128]
        wnorm=jnp.sqrt(jnp.sum(raw["weight"] ** 2, axis=1))[None, :],   # [1, L]
        gamma=raw["gamma"], beta=raw["beta"],
        w2=raw["w2"], b2=raw["b2"],
    )


# --------------------------- pure-JAX reference --------------------------------
def reference_forward(raw, input_ids, token_type_ids, attention_mask, label):
    emb = raw["tok_emb"][input_ids] + raw["seg_emb"][token_type_ids]    # [B,S,H]
    mask = attention_mask.astype(jnp.float32)[..., None]
    pooled_in = jnp.sum(emb * mask, axis=1) / jnp.maximum(jnp.sum(mask, axis=1), 1.0)
    pooled = jnp.tanh(pooled_in @ raw["wp"] + raw["bp"])
    outputs = jnp.tile(pooled, (1, 2))
    # discriminator (training-mode BN batch stats); b1 kept to show it cancels
    h = outputs @ raw["w1"] + raw["b1"]
    mu = jnp.mean(h, axis=0, keepdims=True)
    var = jnp.mean((h - mu) ** 2, axis=0, keepdims=True)
    hn = (h - mu) / jnp.sqrt(var + BN_EPS) * raw["gamma"] + raw["beta"]
    logits_rev = jnp.maximum(hn, 0.0) @ raw["w2"] + raw["b2"]
    # cosine-margin head (module's cosine_sim clamps the norm product)
    ip = outputs @ raw["weight"].T
    xn = jnp.linalg.norm(outputs, axis=1, keepdims=True)
    wn = jnp.linalg.norm(raw["weight"], axis=1, keepdims=True).T
    cos = ip / jnp.maximum(xn * wn, COS_EPS)
    one_hot = jax.nn.one_hot(label, L, dtype=jnp.float32)
    logits = S_SCALE * (cos - one_hot * MARGIN)
    return logits, outputs, logits_rev


# ----------------------------------- main --------------------------------------
if __name__ == "__main__":
    key = jax.random.PRNGKey(0)
    pkey, k_ids, k_lbl = jax.random.split(key, 3)
    raw = init_raw_params(pkey)
    prep = prepare_params(raw)

    input_ids = jax.random.randint(k_ids, (B, S), 0, V, dtype=jnp.int32)
    token_type_ids = jnp.zeros((B, S), jnp.int32)
    attention_mask = jnp.ones((B, S), jnp.int32)
    label = jax.random.randint(k_lbl, (B,), 0, L, dtype=jnp.int32)
    alpha = 0.5

    logits, outputs, logits_revers = my_igd_forward(
        prep, input_ids, token_type_ids, attention_mask, label=label, alpha=alpha)
    jax.block_until_ready((logits, outputs, logits_revers))

    assert logits.shape == (B, L)
    assert outputs.shape == (B, D)
    assert logits_revers.shape == (B, 2)

    with jax.default_matmul_precision("float32"):
        ref_logits, ref_outputs, ref_rev = reference_forward(
            raw, input_ids, token_type_ids, attention_mask, label)
    assert jnp.allclose(logits, ref_logits, atol=1e-2, rtol=1e-2)
    assert jnp.allclose(outputs, ref_outputs, atol=1e-2, rtol=1e-2)
    assert jnp.allclose(logits_revers, ref_rev, atol=1e-2, rtol=1e-2)

    print("KERNEL_OK")
</pallas_src>

<mosaic_0001>
module attributes {stable_mosaic.version = 11 : i64} {
  func.func @fused_forward_kernel(%arg0: memref<8x8xi32, #tpu.memory_space<vmem>>, %arg1: memref<8x8xi32, #tpu.memory_space<vmem>>, %arg2: memref<8x8xf32, #tpu.memory_space<vmem>>, %arg3: memref<8x1xi32, #tpu.memory_space<vmem>>, %arg4: memref<32x16xf32, #tpu.memory_space<vmem>>, %arg5: memref<2x16xf32, #tpu.memory_space<vmem>>, %arg6: memref<16x16xf32, #tpu.memory_space<vmem>>, %arg7: memref<1x16xf32, #tpu.memory_space<vmem>>, %arg8: memref<16x128xf32, #tpu.memory_space<vmem>>, %arg9: memref<1x4xf32, #tpu.memory_space<vmem>>, %arg10: memref<1x32xf32, #tpu.memory_space<vmem>>, %arg11: memref<1x32xf32, #tpu.memory_space<vmem>>, %arg12: memref<32x2xf32, #tpu.memory_space<vmem>>, %arg13: memref<1x2xf32, #tpu.memory_space<vmem>>, %arg14: memref<8x128xf32, #tpu.memory_space<vmem>>) attributes {dimension_semantics = [], scalar_prefetch = 0 : i64, scratch_operands = 0 : i64, tpu.core_type = #tpu.core_type<tc>} {
    %c0 = arith.constant 0 : index
    %c0_0 = arith.constant 0 : index
    %0 = vector.load %arg0[%c0, %c0_0] : memref<8x8xi32, #tpu.memory_space<vmem>>, vector<8x8xi32>
    %c0_1 = arith.constant 0 : index
    %c0_2 = arith.constant 0 : index
    %1 = vector.load %arg1[%c0_1, %c0_2] : memref<8x8xi32, #tpu.memory_space<vmem>>, vector<8x8xi32>
    %c0_3 = arith.constant 0 : index
    %c0_4 = arith.constant 0 : index
    %2 = vector.load %arg2[%c0_3, %c0_4] : memref<8x8xf32, #tpu.memory_space<vmem>>, vector<8x8xf32>
    %3 = tpu.iota {dimensions = array<i32: 1>} : vector<8x32xi32>
    %4 = tpu.iota {dimensions = array<i32: 1>} : vector<8x2xi32>
    %cst = arith.constant 0.000000e+00 : f32
    %5 = vector.broadcast %cst : f32 to vector<8x32xf32>
    %cst_5 = arith.constant 0.000000e+00 : f32
    %6 = vector.broadcast %cst_5 : f32 to vector<8x2xf32>
    %7 = vector.extract_strided_slice %2 {offsets = [0, 0], sizes = [8, 1], strides = [1, 1]} : vector<8x8xf32> to vector<8x1xf32>
    %8 = vector.extract_strided_slice %0 {offsets = [0, 0], sizes = [8, 1], strides = [1, 1]} : vector<8x8xi32> to vector<8x1xi32>
    %9 = vector.broadcast %8 : vector<8x1xi32> to vector<8x32xi32>
    %10 = arith.cmpi eq, %9, %3 : vector<8x32xi32>
    %11 = arith.extui %10 : vector<8x32xi1> to vector<8x32xi32>
    %12 = arith.sitofp %11 : vector<8x32xi32> to vector<8x32xf32>
    %13 = vector.broadcast %7 : vector<8x1xf32> to vector<8x32xf32>
    %14 = arith.mulf %13, %12 : vector<8x32xf32>
    %15 = arith.addf %5, %14 : vector<8x32xf32>
    %16 = vector.extract_strided_slice %1 {offsets = [0, 0], sizes = [8, 1], strides = [1, 1]} : vector<8x8xi32> to vector<8x1xi32>
    %17 = vector.broadcast %16 : vector<8x1xi32> to vector<8x2xi32>
    %18 = arith.cmpi eq, %17, %4 : vector<8x2xi32>
    %19 = arith.extui %18 : vector<8x2xi1> to vector<8x2xi32>
    %20 = arith.sitofp %19 : vector<8x2xi32> to vector<8x2xf32>
    %21 = vector.broadcast %7 : vector<8x1xf32> to vector<8x2xf32>
    %22 = arith.mulf %21, %20 : vector<8x2xf32>
    %23 = arith.addf %6, %22 : vector<8x2xf32>
    %24 = vector.extract_strided_slice %2 {offsets = [0, 1], sizes = [8, 1], strides = [1, 1]} : vector<8x8xf32> to vector<8x1xf32>
    %25 = vector.extract_strided_slice %0 {offsets = [0, 1], sizes = [8, 1], strides = [1, 1]} : vector<8x8xi32> to vector<8x1xi32>
    %26 = vector.broadcast %25 : vector<8x1xi32> to vector<8x32xi32>
    %27 = arith.cmpi eq, %26, %3 : vector<8x32xi32>
    %28 = arith.extui %27 : vector<8x32xi1> to vector<8x32xi32>
    %29 = arith.sitofp %28 : vector<8x32xi32> to vector<8x32xf32>
    %30 = vector.broadcast %24 : vector<8x1xf32> to vector<8x32xf32>
    %31 = arith.mulf %30, %29 : vector<8x32xf32>
    %32 = arith.addf %15, %31 : vector<8x32xf32>
    %33 = vector.extract_strided_slice %1 {offsets = [0, 1], sizes = [8, 1], strides = [1, 1]} : vector<8x8xi32> to vector<8x1xi32>
    %34 = vector.broadcast %33 : vector<8x1xi32> to vector<8x2xi32>
    %35 = arith.cmpi eq, %34, %4 : vector<8x2xi32>
    %36 = arith.extui %35 : vector<8x2xi1> to vector<8x2xi32>
    %37 = arith.sitofp %36 : vector<8x2xi32> to vector<8x2xf32>
    %38 = vector.broadcast %24 : vector<8x1xf32> to vector<8x2xf32>
    %39 = arith.mulf %38, %37 : vector<8x2xf32>
    %40 = arith.addf %23, %39 : vector<8x2xf32>
    %41 = vector.extract_strided_slice %2 {offsets = [0, 2], sizes = [8, 1], strides = [1, 1]} : vector<8x8xf32> to vector<8x1xf32>
    %42 = vector.extract_strided_slice %0 {offsets = [0, 2], sizes = [8, 1], strides = [1, 1]} : vector<8x8xi32> to vector<8x1xi32>
    %43 = vector.broadcast %42 : vector<8x1xi32> to vector<8x32xi32>
    %44 = arith.cmpi eq, %43, %3 : vector<8x32xi32>
    %45 = arith.extui %44 : vector<8x32xi1> to vector<8x32xi32>
    %46 = arith.sitofp %45 : vector<8x32xi32> to vector<8x32xf32>
    %47 = vector.broadcast %41 : vector<8x1xf32> to vector<8x32xf32>
    %48 = arith.mulf %47, %46 : vector<8x32xf32>
    %49 = arith.addf %32, %48 : vector<8x32xf32>
    %50 = vector.extract_strided_slice %1 {offsets = [0, 2], sizes = [8, 1], strides = [1, 1]} : vector<8x8xi32> to vector<8x1xi32>
    %51 = vector.broadcast %50 : vector<8x1xi32> to vector<8x2xi32>
    %52 = arith.cmpi eq, %51, %4 : vector<8x2xi32>
    %53 = arith.extui %52 : vector<8x2xi1> to vector<8x2xi32>
    %54 = arith.sitofp %53 : vector<8x2xi32> to vector<8x2xf32>
    %55 = vector.broadcast %41 : vector<8x1xf32> to vector<8x2xf32>
    %56 = arith.mulf %55, %54 : vector<8x2xf32>
    %57 = arith.addf %40, %56 : vector<8x2xf32>
    %58 = vector.extract_strided_slice %2 {offsets = [0, 3], sizes = [8, 1], strides = [1, 1]} : vector<8x8xf32> to vector<8x1xf32>
    %59 = vector.extract_strided_slice %0 {offsets = [0, 3], sizes = [8, 1], strides = [1, 1]} : vector<8x8xi32> to vector<8x1xi32>
    %60 = vector.broadcast %59 : vector<8x1xi32> to vector<8x32xi32>
    %61 = arith.cmpi eq, %60, %3 : vector<8x32xi32>
    %62 = arith.extui %61 : vector<8x32xi1> to vector<8x32xi32>
    %63 = arith.sitofp %62 : vector<8x32xi32> to vector<8x32xf32>
    %64 = vector.broadcast %58 : vector<8x1xf32> to vector<8x32xf32>
    %65 = arith.mulf %64, %63 : vector<8x32xf32>
    %66 = arith.addf %49, %65 : vector<8x32xf32>
    %67 = vector.extract_strided_slice %1 {offsets = [0, 3], sizes = [8, 1], strides = [1, 1]} : vector<8x8xi32> to vector<8x1xi32>
    %68 = vector.broadcast %67 : vector<8x1xi32> to vector<8x2xi32>
    %69 = arith.cmpi eq, %68, %4 : vector<8x2xi32>
    %70 = arith.extui %69 : vector<8x2xi1> to vector<8x2xi32>
    %71 = arith.sitofp %70 : vector<8x2xi32> to vector<8x2xf32>
    %72 = vector.broadcast %58 : vector<8x1xf32> to vector<8x2xf32>
    %73 = arith.mulf %72, %71 : vector<8x2xf32>
    %74 = arith.addf %57, %73 : vector<8x2xf32>
    %75 = vector.extract_strided_slice %2 {offsets = [0, 4], sizes = [8, 1], strides = [1, 1]} : vector<8x8xf32> to vector<8x1xf32>
    %76 = vector.extract_strided_slice %0 {offsets = [0, 4], sizes = [8, 1], strides = [1, 1]} : vector<8x8xi32> to vector<8x1xi32>
    %77 = vector.broadcast %76 : vector<8x1xi32> to vector<8x32xi32>
    %78 = arith.cmpi eq, %77, %3 : vector<8x32xi32>
    %79 = arith.extui %78 : vector<8x32xi1> to vector<8x32xi32>
    %80 = arith.sitofp %79 : vector<8x32xi32> to vector<8x32xf32>
    %81 = vector.broadcast %75 : vector<8x1xf32> to vector<8x32xf32>
    %82 = arith.mulf %81, %80 : vector<8x32xf32>
    %83 = arith.addf %66, %82 : vector<8x32xf32>
    %84 = vector.extract_strided_slice %1 {offsets = [0, 4], sizes = [8, 1], strides = [1, 1]} : vector<8x8xi32> to vector<8x1xi32>
    %85 = vector.broadcast %84 : vector<8x1xi32> to vector<8x2xi32>
    %86 = arith.cmpi eq, %85, %4 : vector<8x2xi32>
    %87 = arith.extui %86 : vector<8x2xi1> to vector<8x2xi32>
    %88 = arith.sitofp %87 : vector<8x2xi32> to vector<8x2xf32>
    %89 = vector.broadcast %75 : vector<8x1xf32> to vector<8x2xf32>
    %90 = arith.mulf %89, %88 : vector<8x2xf32>
    %91 = arith.addf %74, %90 : vector<8x2xf32>
    %92 = vector.extract_strided_slice %2 {offsets = [0, 5], sizes = [8, 1], strides = [1, 1]} : vector<8x8xf32> to vector<8x1xf32>
    %93 = vector.extract_strided_slice %0 {offsets = [0, 5], sizes = [8, 1], strides = [1, 1]} : vector<8x8xi32> to vector<8x1xi32>
    %94 = vector.broadcast %93 : vector<8x1xi32> to vector<8x32xi32>
    %95 = arith.cmpi eq, %94, %3 : vector<8x32xi32>
    %96 = arith.extui %95 : vector<8x32xi1> to vector<8x32xi32>
    %97 = arith.sitofp %96 : vector<8x32xi32> to vector<8x32xf32>
    %98 = vector.broadcast %92 : vector<8x1xf32> to vector<8x32xf32>
    %99 = arith.mulf %98, %97 : vector<8x32xf32>
    %100 = arith.addf %83, %99 : vector<8x32xf32>
    %101 = vector.extract_strided_slice %1 {offsets = [0, 5], sizes = [8, 1], strides = [1, 1]} : vector<8x8xi32> to vector<8x1xi32>
    %102 = vector.broadcast %101 : vector<8x1xi32> to vector<8x2xi32>
    %103 = arith.cmpi eq, %102, %4 : vector<8x2xi32>
    %104 = arith.extui %103 : vector<8x2xi1> to vector<8x2xi32>
    %105 = arith.sitofp %104 : vector<8x2xi32> to vector<8x2xf32>
    %106 = vector.broadcast %92 : vector<8x1xf32> to vector<8x2xf32>
    %107 = arith.mulf %106, %105 : vector<8x2xf32>
    %108 = arith.addf %91, %107 : vector<8x2xf32>
    %109 = vector.extract_strided_slice %2 {offsets = [0, 6], sizes = [8, 1], strides = [1, 1]} : vector<8x8xf32> to vector<8x1xf32>
    %110 = vector.extract_strided_slice %0 {offsets = [0, 6], sizes = [8, 1], strides = [1, 1]} : vector<8x8xi32> to vector<8x1xi32>
    %111 = vector.broadcast %110 : vector<8x1xi32> to vector<8x32xi32>
    %112 = arith.cmpi eq, %111, %3 : vector<8x32xi32>
    %113 = arith.extui %112 : vector<8x32xi1> to vector<8x32xi32>
    %114 = arith.sitofp %113 : vector<8x32xi32> to vector<8x32xf32>
    %115 = vector.broadcast %109 : vector<8x1xf32> to vector<8x32xf32>
    %116 = arith.mulf %115, %114 : vector<8x32xf32>
    %117 = arith.addf %100, %116 : vector<8x32xf32>
    %118 = vector.extract_strided_slice %1 {offsets = [0, 6], sizes = [8, 1], strides = [1, 1]} : vector<8x8xi32> to vector<8x1xi32>
    %119 = vector.broadcast %118 : vector<8x1xi32> to vector<8x2xi32>
    %120 = arith.cmpi eq, %119, %4 : vector<8x2xi32>
    %121 = arith.extui %120 : vector<8x2xi1> to vector<8x2xi32>
    %122 = arith.sitofp %121 : vector<8x2xi32> to vector<8x2xf32>
    %123 = vector.broadcast %109 : vector<8x1xf32> to vector<8x2xf32>
    %124 = arith.mulf %123, %122 : vector<8x2xf32>
    %125 = arith.addf %108, %124 : vector<8x2xf32>
    %126 = vector.extract_strided_slice %2 {offsets = [0, 7], sizes = [8, 1], strides = [1, 1]} : vector<8x8xf32> to vector<8x1xf32>
    %127 = vector.extract_strided_slice %0 {offsets = [0, 7], sizes = [8, 1], strides = [1, 1]} : vector<8x8xi32> to vector<8x1xi32>
    %128 = vector.broadcast %127 : vector<8x1xi32> to vector<8x32xi32>
    %129 = arith.cmpi eq, %128, %3 : vector<8x32xi32>
    %130 = arith.extui %129 : vector<8x32xi1> to vector<8x32xi32>
    %131 = arith.sitofp %130 : vector<8x32xi32> to vector<8x32xf32>
    %132 = vector.broadcast %126 : vector<8x1xf32> to vector<8x32xf32>
    %133 = arith.mulf %132, %131 : vector<8x32xf32>
    %134 = arith.addf %117, %133 : vector<8x32xf32>
    %135 = vector.extract_strided_slice %1 {offsets = [0, 7], sizes = [8, 1], strides = [1, 1]} : vector<8x8xi32> to vector<8x1xi32>
    %136 = vector.broadcast %135 : vector<8x1xi32> to vector<8x2xi32>
    %137 = arith.cmpi eq, %136, %4 : vector<8x2xi32>
    %138 = arith.extui %137 : vector<8x2xi1> to vector<8x2xi32>
    %139 = arith.sitofp %138 : vector<8x2xi32> to vector<8x2xf32>
    %140 = vector.broadcast %126 : vector<8x1xf32> to vector<8x2xf32>
    %141 = arith.mulf %140, %139 : vector<8x2xf32>
    %142 = arith.addf %125, %141 : vector<8x2xf32>
    %cst_6 = arith.constant dense<0.000000e+00> : vector<8xf32>
    %143 = vector.multi_reduction <add>, %2, %cst_6 [1] : vector<8x8xf32> to vector<8xf32>
    %144 = vector.shape_cast %143 : vector<8xf32> to vector<8x1xf32>
    %c0_7 = arith.constant 0 : index
    %c0_8 = arith.constant 0 : index
    %145 = vector.load %arg4[%c0_7, %c0_8] : memref<32x16xf32, #tpu.memory_space<vmem>>, vector<32x16xf32>
    %cst_9 = arith.constant dense<0.000000e+00> : vector<8x16xf32>
    %146 = tpu.matmul %134, %145, %cst_9 {dimension_numbers = #tpu.dot_dimension_numbers<[1], [0], [0], [1], [0, 0, 1, 1], [], []>} : vector<8x32xf32>, vector<32x16xf32>, vector<8x16xf32> -> vector<8x16xf32>
    %c0_10 = arith.constant 0 : index
    %c0_11 = arith.constant 0 : index
    %147 = vector.load %arg5[%c0_10, %c0_11] : memref<2x16xf32, #tpu.memory_space<vmem>>, vector<2x16xf32>
    %cst_12 = arith.constant dense<0.000000e+00> : vector<8x16xf32>
    %148 = tpu.matmul %142, %147, %cst_12 {dimension_numbers = #tpu.dot_dimension_numbers<[1], [0], [0], [1], [0, 0, 1, 1], [], []>} : vector<8x2xf32>, vector<2x16xf32>, vector<8x16xf32> -> vector<8x16xf32>
    %149 = arith.addf %146, %148 : vector<8x16xf32>
    %cst_13 = arith.constant 1.000000e+00 : f32
    %150 = vector.broadcast %cst_13 : f32 to vector<8x1xf32>
    %151 = arith.maximumf %144, %150 : vector<8x1xf32>
    %152 = vector.broadcast %151 : vector<8x1xf32> to vector<8x16xf32>
    %153 = arith.divf %149, %152 : vector<8x16xf32>
    %c0_14 = arith.constant 0 : index
    %c0_15 = arith.constant 0 : index
    %154 = vector.load %arg6[%c0_14, %c0_15] : memref<16x16xf32, #tpu.memory_space<vmem>>, vector<16x16xf32>
    %cst_16 = arith.constant dense<0.000000e+00> : vector<8x16xf32>
    %155 = tpu.matmul %153, %154, %cst_16 {dimension_numbers = #tpu.dot_dimension_numbers<[1], [0], [0], [1], [0, 0, 1, 1], [], []>} : vector<8x16xf32>, vector<16x16xf32>, vector<8x16xf32> -> vector<8x16xf32>
    %c0_17 = arith.constant 0 : index
    %c0_18 = arith.constant 0 : index
    %156 = vector.load %arg7[%c0_17, %c0_18] : memref<1x16xf32, #tpu.memory_space<vmem>>, vector<1x16xf32>
    %157 = vector.broadcast %156 : vector<1x16xf32> to vector<8x16xf32>
    %158 = arith.addf %155, %157 : vector<8x16xf32>
    %159 = math.tanh %158 : vector<8x16xf32>
    %c0_19 = arith.constant 0 : index
    %c0_20 = arith.constant 0 : index
    %160 = vector.load %arg8[%c0_19, %c0_20] : memref<16x128xf32, #tpu.memory_space<vmem>>, vector<16x128xf32>
    %cst_21 = arith.constant dense<0.000000e+00> : vector<8x128xf32>
    %161 = tpu.matmul %159, %160, %cst_21 {dimension_numbers = #tpu.dot_dimension_numbers<[1], [0], [0], [1], [0, 0, 1, 1], [], []>} : vector<8x16xf32>, vector<16x128xf32>, vector<8x128xf32> -> vector<8x128xf32>
    %162 = vector.extract_strided_slice %161 {offsets = [0, 0], sizes = [8, 4], strides = [1, 1]} : vector<8x128xf32> to vector<8x4xf32>
    %163 = vector.extract_strided_slice %161 {offsets = [0, 32], sizes = [8, 32], strides = [1, 1]} : vector<8x128xf32> to vector<8x32xf32>
    %cst_22 = arith.constant dense<0.000000e+00> : vector<32xf32>
    %164 = vector.multi_reduction <add>, %163, %cst_22 [0] : vector<8x32xf32> to vector<32xf32>
    %165 = vector.shape_cast %164 : vector<32xf32> to vector<1x32xf32>
    %cst_23 = arith.constant 8.000000e+00 : f32
    %166 = vector.broadcast %cst_23 : f32 to vector<1x32xf32>
    %167 = arith.divf %165, %166 : vector<1x32xf32>
    %168 = vector.broadcast %167 : vector<1x32xf32> to vector<8x32xf32>
    %169 = arith.subf %163, %168 : vector<8x32xf32>
    %170 = arith.mulf %169, %169 : vector<8x32xf32>
    %cst_24 = arith.constant dense<0.000000e+00> : vector<32xf32>
    %171 = vector.multi_reduction <add>, %170, %cst_24 [0] : vector<8x32xf32> to vector<32xf32>
    %172 = vector.shape_cast %171 : vector<32xf32> to vector<1x32xf32>
    %cst_25 = arith.constant 8.000000e+00 : f32
    %173 = vector.broadcast %cst_25 : f32 to vector<1x32xf32>
    %174 = arith.divf %172, %173 : vector<1x32xf32>
    %175 = vector.broadcast %167 : vector<1x32xf32> to vector<8x32xf32>
    %176 = arith.subf %163, %175 : vector<8x32xf32>
    %cst_26 = arith.constant 9.99999974E-6 : f32
    %177 = vector.broadcast %cst_26 : f32 to vector<1x32xf32>
    %178 = arith.addf %174, %177 : vector<1x32xf32>
    %179 = math.rsqrt %178 : vector<1x32xf32>
    %180 = vector.broadcast %179 : vector<1x32xf32> to vector<8x32xf32>
    %181 = arith.mulf %176, %180 : vector<8x32xf32>
    %c0_27 = arith.constant 0 : index
    %c0_28 = arith.constant 0 : index
    %182 = vector.load %arg10[%c0_27, %c0_28] : memref<1x32xf32, #tpu.memory_space<vmem>>, vector<1x32xf32>
    %183 = vector.broadcast %182 : vector<1x32xf32> to vector<8x32xf32>
    %184 = arith.mulf %181, %183 : vector<8x32xf32>
    %c0_29 = arith.constant 0 : index
    %c0_30 = arith.constant 0 : index
    %185 = vector.load %arg11[%c0_29, %c0_30] : memref<1x32xf32, #tpu.memory_space<vmem>>, vector<1x32xf32>
    %186 = vector.broadcast %185 : vector<1x32xf32> to vector<8x32xf32>
    %187 = arith.addf %184, %186 : vector<8x32xf32>
    %cst_31 = arith.constant 0.000000e+00 : f32
    %188 = vector.broadcast %cst_31 : f32 to vector<8x32xf32>
    %189 = arith.maximumf %187, %188 : vector<8x32xf32>
    %c0_32 = arith.constant 0 : index
    %c0_33 = arith.constant 0 : index
    %190 = vector.load %arg12[%c0_32, %c0_33] : memref<32x2xf32, #tpu.memory_space<vmem>>, vector<32x2xf32>
    %cst_34 = arith.constant dense<0.000000e+00> : vector<8x2xf32>
    %191 = tpu.matmul %189, %190, %cst_34 {dimension_numbers = #tpu.dot_dimension_numbers<[1], [0], [0], [1], [0, 0, 1, 1], [], []>} : vector<8x32xf32>, vector<32x2xf32>, vector<8x2xf32> -> vector<8x2xf32>
    %c0_35 = arith.constant 0 : index
    %c0_36 = arith.constant 0 : index
    %192 = vector.load %arg13[%c0_35, %c0_36] : memref<1x2xf32, #tpu.memory_space<vmem>>, vector<1x2xf32>
    %193 = vector.broadcast %192 : vector<1x2xf32> to vector<8x2xf32>
    %194 = arith.addf %191, %193 : vector<8x2xf32>
    %195 = arith.mulf %159, %159 : vector<8x16xf32>
    %cst_37 = arith.constant dense<0.000000e+00> : vector<8xf32>
    %196 = vector.multi_reduction <add>, %195, %cst_37 [1] : vector<8x16xf32> to vector<8xf32>
    %197 = vector.shape_cast %196 : vector<8xf32> to vector<8x1xf32>
    %cst_38 = arith.constant 2.000000e+00 : f32
    %198 = vector.broadcast %cst_38 : f32 to vector<8x1xf32>
    %199 = arith.mulf %198, %197 : vector<8x1xf32>
    %200 = math.sqrt %199 : vector<8x1xf32>
    %c0_39 = arith.constant 0 : index
    %c0_40 = arith.constant 0 : index
    %201 = vector.load %arg9[%c0_39, %c0_40] : memref<1x4xf32, #tpu.memory_space<vmem>>, vector<1x4xf32>
    %202 = vector.broadcast %200 : vector<8x1xf32> to vector<8x4xf32>
    %203 = vector.broadcast %201 : vector<1x4xf32> to vector<8x4xf32>
    %204 = arith.mulf %202, %203 : vector<8x4xf32>
    %cst_41 = arith.constant 9.99999993E-9 : f32
    %205 = vector.broadcast %cst_41 : f32 to vector<8x4xf32>
    %206 = arith.maximumf %204, %205 : vector<8x4xf32>
    %207 = arith.divf %162, %206 : vector<8x4xf32>
    %208 = tpu.iota {dimensions = array<i32: 1>} : vector<8x4xi32>
    %c0_42 = arith.constant 0 : index
    %c0_43 = arith.constant 0 : index
    %209 = vector.load %arg3[%c0_42, %c0_43] : memref<8x1xi32, #tpu.memory_space<vmem>>, vector<8x1xi32>
    %210 = vector.broadcast %209 : vector<8x1xi32> to vector<8x4xi32>
    %211 = arith.cmpi eq, %208, %210 : vector<8x4xi32>
    %212 = arith.extui %211 : vector<8x4xi1> to vector<8x4xi32>
    %213 = arith.sitofp %212 : vector<8x4xi32> to vector<8x4xf32>
    %cst_44 = arith.constant 3.500000e-01 : f32
    %214 = vector.broadcast %cst_44 : f32 to vector<8x4xf32>
    %215 = arith.mulf %213, %214 : vector<8x4xf32>
    %216 = arith.subf %207, %215 : vector<8x4xf32>
    %cst_45 = arith.constant 1.000000e+00 : f32
    %217 = vector.broadcast %cst_45 : f32 to vector<8x4xf32>
    %218 = arith.mulf %217, %216 : vector<8x4xf32>
    %cst_46 = arith.constant 0.000000e+00 : f32
    %219 = vector.broadcast %cst_46 : f32 to vector<8x128xf32>
    %c0_47 = arith.constant 0 : index
    %c0_48 = arith.constant 0 : index
    %220 = vector.load %arg14[%c0_47, %c0_48] : memref<8x128xf32, #tpu.memory_space<vmem>>, vector<8x128xf32>
    tpu.vector_store %arg14[%c0_47, %c0_48], %219 {strides = array<i32>} : memref<8x128xf32, #tpu.memory_space<vmem>>, vector<8x128xf32>,
    %c0_49 = arith.constant 0 : index
    %c0_50 = arith.constant 0 : index
    %221 = vector.load %arg14[%c0_49, %c0_50] : memref<8x128xf32, #tpu.memory_space<vmem>>, vector<8x4xf32>
    tpu.vector_store %arg14[%c0_49, %c0_50], %218 {strides = array<i32>} : memref<8x128xf32, #tpu.memory_space<vmem>>, vector<8x4xf32>,
    %c0_51 = arith.constant 0 : index
    %c8 = arith.constant 8 : index
    %222 = vector.load %arg14[%c0_51, %c8] : memref<8x128xf32, #tpu.memory_space<vmem>>, vector<8x2xf32>
    tpu.vector_store %arg14[%c0_51, %c8], %194 {strides = array<i32>} : memref<8x128xf32, #tpu.memory_space<vmem>>, vector<8x2xf32>,
    %c0_52 = arith.constant 0 : index
    %c32 = arith.constant 32 : index
    %223 = vector.load %arg14[%c0_52, %c32] : memref<8x128xf32, #tpu.memory_space<vmem>>, vector<8x16xf32>
    tpu.vector_store %arg14[%c0_52, %c32], %159 {strides = array<i32>} : memref<8x128xf32, #tpu.memory_space<vmem>>, vector<8x16xf32>,
    %c0_53 = arith.constant 0 : index
    %c48 = arith.constant 48 : index
    %224 = vector.load %arg14[%c0_53, %c48] : memref<8x128xf32, #tpu.memory_space<vmem>>, vector<8x16xf32>
    tpu.vector_store %arg14[%c0_53, %c48], %159 {strides = array<i32>} : memref<8x128xf32, #tpu.memory_space<vmem>>, vector<8x16xf32>,
    return
  }
}

</mosaic_0001>

<bundles_post_ra>
// kernel: tpu_custom_call.1
= control target key start
LH: loop header
LB: loop body
LE: loop exit
PB: predicated region body
PF: predicated region fallthrough
CT: control target
= control target key end

     0   :  { %v881_v1 = vmov 1   ;;  %v882_v2 = vmov 0   ;;  %s1115_s0 = inlined_call_operand.vmem [shape: s32[8,8], index: 0, kind: input, shape index: {}]   ;;  %s1116_s1 = inlined_call_operand.vmem [shape: s32[8,8], index: 1, kind: input, shape index: {}]   ;;  %s1117_s2 = inlined_call_operand.vmem [shape: f32[8,8], index: 2, kind: input, shape index: {}]   ;;  %s1118_s3 = inlined_call_operand.vmem [shape: s32[8,1], index: 3, kind: input, shape index: {}]   ;;  %s1119_s4 = inlined_call_operand.vmem [shape: f32[32,16], index: 4, kind: input, shape index: {}]   ;;  %s1120_s5 = inlined_call_operand.vmem [shape: f32[2,16], index: 5, kind: input, shape index: {}]   ;;  %s1121_s6 = inlined_call_operand.vmem [shape: f32[16,16], index: 6, kind: input, shape index: {}]   ;;  %s1122_s7 = inlined_call_operand.vmem [shape: f32[1,16], index: 7, kind: input, shape index: {}]   ;;  %s1123_s8 = inlined_call_operand.vmem [shape: f32[16,128], index: 8, kind: input, shape index: {}]   ;;  %s1124_s9 = inlined_call_operand.vmem [shape: f32[1,4], index: 9, kind: input, shape index: {}]   ;;  %s1125_s10 = inlined_call_operand.vmem [shape: f32[1,32], index: 10, kind: input, shape index: {}]   ;;  %s1126_s11 = inlined_call_operand.vmem [shape: f32[1,32], index: 11, kind: input, shape index: {}]   ;;  %s1127_s12 = inlined_call_operand.vmem [shape: f32[32,2], index: 12, kind: input, shape index: {}]   ;;  %s1128_s13 = inlined_call_operand.vmem [shape: f32[1,2], index: 13, kind: input, shape index: {}]   ;;  %s1129_s14 = inlined_call_operand.hbm [shape: f32[8,128], index: 14, kind: output, shape index: {}]  }
   0x1   :  { %v48_v0 = vld [vmem:[%s1115_s0] sm:$0xff]  ;;  %835 = vset.pattern.permute.xlu1 %v881_v1  ;;  %834 = vset.pattern.permute.xlu0 %v882_v2 }
   0x2   :  { %19 = vsyncpa [#allocation3], 0  ;;  %75 = vperm.xlu1 %835, %v48_v0   ;;  %54 = vperm.xlu0 %834, %v48_v0   ;;  %v49_v3 = vld [vmem:[%s1116_s1] sm:$0xff]  ;;  %v883_v4 = vmov 0.0   ;;  %v884_v6 = vmov 2   ;;  %v885_v7 = vmov 3   ;;  %v51_v31 = vlaneseq }
   0x3   :  { %699 = vst [vmem:[#allocation2] sm:$0xff] %v883_v4  ;;  %783 = vmatprep.subr.mxu1 %v883_v4  ;;  %778 = vmatprep.subr.mxu0 %v883_v4  ;;  %v50_v5 = vld [vmem:[%s1117_s2] sm:$0xff]  ;;  %v886_v8 = vmov 4   ;;  %v887_v9 = vmov 5   ;;  %v888_v10 = vmov 6   ;;  %v889_v11 = vmov 7  }
   0x4   :  { %v221_v12 = vld [vmem:[%s1119_s4 + $0x18] sm:$0xff]  ;;  %v220_v13 = vld [vmem:[%s1119_s4 + $0x10] sm:$0xff]  ;;  %v219_v14 = vld [vmem:[%s1119_s4 + $0x8] sm:$0xff]  ;;  %vm227_vm0 = vcmask 1041408   ;;  %vm890_vm1 = vmmov 0   ;;  %vm214_vm2 = vcmask 64512  }
   0x5   :  { %784 = vmatpush3.msra.mxu1 %v221_v12  ;;  %v222_v15 = vld [vmem:[%s1120_s5] sm:$0x3]  ;;  %780 = vmatprep.mubr.msk.f32.mxu0 %vm890_vm1, %v883_v4  ;;  %v215_v17 = vsel %vm214_vm2, %v50_v5, 0.0  ;;  %v1007_v33 = vand.u32 127, %v51_v31  ;;  %s891_s0 = smov 32   ;;  %s894_s26 = smov 48  }
   0x6   :  { %87 = vperm.xlu1 %835, %v49_v3   ;;  %67 = vperm.xlu0 %834, %v49_v3   ;;  %v218_v16 = vld [vmem:[%s1119_s4] sm:$0xff]  ;;  %s895_s27 = smov [#allocation2]  }
   0x7   :  { %785 = vmatprep.subr.mxu1 %v883_v4  ;;  %779 = vmatpush3.msk.msra.mxu0 %vm227_vm0, %v222_v15 }
   0x8   :  { %786 = vmatpush3.msra.mxu1 %v220_v13  ;;  %791 = vmatprep.mubr.msk.f32.mxu1 %vm890_vm1, %v883_v4 }
   0x9   :  { %787 = vmatprep.subr.mxu1 %v883_v4  ;;  %794 = vmatprep.subr.mxu0 %v883_v4 }
   0xa   :  { %81 = vperm.xlu1 %835, %v50_v5   ;;  %61 = vperm.xlu0 %834, %v50_v5  }
   0xb   :  { %788 = vmatpush3.msra.mxu1 %v219_v14 }
   0xc   :  { %789 = vmatprep.subr.mxu1 %v883_v4 }
   0xd   :  { %790 = vmatpush3.msra.mxu1 %v218_v16 }
   0xe   :  { %837 = vset.pattern.permute.xlu1 %v884_v6  ;;  %836 = vset.pattern.permute.xlu0 %v884_v6 }
   0xf   :  { %107 = vperm.xlu1 %837, %v49_v3   ;;  %95 = vperm.xlu0 %836, %v48_v0  }
  0x10   :  { %808 = vmatprep.subr.mxu1 %v883_v4 }
  0x13   :  { %101 = vperm.xlu1 %837, %v50_v5   ;;  %838 = vset.pattern.permute.xlu0 %v885_v7 }
  0x14   :  { %115 = vperm.xlu0 %838, %v48_v0  }
  0x17   :  { %839 = vset.pattern.permute.xlu1 %v885_v7 }
  0x18   :  { %127 = vperm.xlu1 %839, %v49_v3   ;;  %840 = vset.pattern.permute.xlu0 %v886_v8 }
  0x19   :  { %135 = vperm.xlu0 %840, %v48_v0  }
  0x1c   :  { %121 = vperm.xlu1 %839, %v50_v5  }
  0x1d   :  { %842 = vset.pattern.permute.xlu0 %v887_v9 }
  0x1e   :  { %155 = vperm.xlu0 %842, %v48_v0  }
  0x20   :  { %841 = vset.pattern.permute.xlu1 %v886_v8 }
  0x21   :  { %147 = vperm.xlu1 %841, %v49_v3  }
  0x22   :  { %844 = vset.pattern.permute.xlu0 %v888_v10 }
  0x23   :  { %175 = vperm.xlu0 %844, %v48_v0  }
  0x25   :  { %141 = vperm.xlu1 %841, %v50_v5  }
  0x27   :  { %846 = vset.pattern.permute.xlu0 %v889_v11 }
  0x28   :  { %195 = vperm.xlu0 %846, %v48_v0  }
  0x29   :  { %843 = vset.pattern.permute.xlu1 %v887_v9 }
  0x2a   :  { %167 = vperm.xlu1 %843, %v49_v3  }
  0x2c   :  { %848 = vset.pattern.permute.xlu0 %v882_v2 }
  0x2e   :  { %161 = vperm.xlu1 %843, %v50_v5  }
  0x32   :  { %845 = vset.pattern.permute.xlu1 %v888_v10 }
  0x33   :  { %187 = vperm.xlu1 %845, %v49_v3  }
  0x37   :  { %181 = vperm.xlu1 %845, %v50_v5  }
  0x3b   :  { %847 = vset.pattern.permute.xlu1 %v889_v11 }
  0x3c   :  { %207 = vperm.xlu1 %847, %v49_v3  }
  0x40   :  { %201 = vperm.xlu1 %847, %v50_v5  }
  0x47   :  { %216 = vadd.xlane.f32.xlu0 %v215_v17 }
  0x7d   :  { %v76_v18 = vpop.permute.xlu1 %75  ;;  %v55_v23 = vpop.permute.xlu0 %54 }
  0x7e   :  { %vm56_vm3 = vcmp.eq.s32.totalorder %v55_v23, %v1007_v33  ;;  %vm77_vm5 = vcmp.eq.s32.totalorder %v76_v18, %v1007_v33 }
  0x7f   :  { %v732_v37 = vsel %vm56_vm3, 1.0, %v883_v4  ;;  %v734_v40 = vsel %vm77_vm5, 1.0, %v883_v4  ;;  %vm301_vm5 = vcmask 261120  }
  0x81   :  { %v88_v19 = vpop.permute.xlu1 %87  ;;  %v68_v25 = vpop.permute.xlu0 %67 }
  0x82   :  { %vm69_vm4 = vcmp.eq.s32.totalorder %v68_v25, %v1007_v33  ;;  %vm89_vm7 = vcmp.eq.s32.totalorder %v88_v19, %v1007_v33 }
  0x83   :  { %v733_v38 = vsel %vm69_vm4, 1.0, %v883_v4  ;;  %v735_v42 = vsel %vm89_vm7, 1.0, %v883_v4  ;;  %vm223_vm4 = vcmask 15360  }
  0x85   :  { %v82_v20 = vpop.permute.xlu1 %81  ;;  %v62_v27 = vpop.permute.xlu0 %61 }
  0x86   :  { %v84_v43 = vmul.f32 %v734_v40, %v82_v20  ;;  %v64_v44 = vmul.f32 %v732_v37, %v62_v27  ;;  %v92_v45 = vmul.f32 %v735_v42, %v82_v20  ;;  %v72_v46 = vmul.f32 %v733_v38, %v62_v27  ;;  %v379_v27 = vld [vmem:[%s1121_s6 + $0x8] sm:$0xff]  ;;  %v462_v40 = vld [vmem:[%s1123_s8] sm:$0xff] }
  0x87   :  { %v755_v42 = vld [vmem:[%s1126_s11] ss:$0 sm:$0xff] }
  0x88   :  { %v85_v54 = vadd.f32 %v84_v43, %v64_v44  ;;  %v93_v57 = vadd.f32 %v92_v45, %v72_v46  ;;  %v751_v43 = vld [vmem:[%s1122_s7] ss:$0 sm:$0xff] }
  0x8a   :  { %v108_v21 = vpop.permute.xlu1 %107  ;;  %v96_v29 = vpop.permute.xlu0 %95 }
  0x8b   :  { %vm97_vm6 = vcmp.eq.s32.totalorder %v96_v29, %v1007_v33  ;;  %vm109_vm9 = vcmp.eq.s32.totalorder %v108_v21, %v1007_v33 }
  0x8c   :  { %v736_v41 = vsel %vm97_vm6, 1.0, %v883_v4  ;;  %v737_v49 = vsel %vm109_vm9, 1.0, %v883_v4  ;;  %vm387_vm6 = vcmask 130048  }
  0x8e   :  { %v102_v22 = vpop.permute.xlu1 %101 }
  0x8f   :  { %v116_v32 = vpop.permute.xlu0 %115  ;;  %v104_v50 = vmul.f32 %v736_v41, %v102_v22  ;;  %v112_v52 = vmul.f32 %v737_v49, %v102_v22  ;;  %v754_v41 = vld [vmem:[%s1125_s10] ss:$0 sm:$0xff]  ;;  %v584_v49 = vld [vmem:[%s1127_s12 + $0x18] sm:$0xff] }
  0x90   :  { %vm117_vm8 = vcmp.eq.s32.totalorder %v116_v32, %v1007_v33  ;;  %566 = vrot.lane.b32.xlu1 %v754_v41, %s891_s0 }
  0x91   :  { %v738_v47 = vsel %vm117_vm8, 1.0, %v883_v4  ;;  %v105_v60 = vadd.f32 %v104_v50, %v85_v54  ;;  %v113_v1 = vadd.f32 %v112_v52, %v93_v57  ;;  %v583_v50 = vld [vmem:[%s1127_s12 + $0x10] sm:$0xff]  ;;  %v581_v52 = vld [vmem:[%s1127_s12] sm:$0xff] }
  0x93   :  { %v128_v24 = vpop.permute.xlu1 %127 }
  0x94   :  { %v136_v35 = vpop.permute.xlu0 %135  ;;  %vm129_vm11 = vcmp.eq.s32.totalorder %v128_v24, %v1007_v33  ;;  %576 = vrot.lane.b32.xlu1 %v755_v42, %s891_s0 }
  0x95   :  { %vm137_vm10 = vcmp.eq.s32.totalorder %v136_v35, %v1007_v33  ;;  %v739_v55 = vsel %vm129_vm11, 1.0, %v883_v4  ;;  %vm706_vm11 = vcmask 80960  }
  0x96   :  { %v740_v53 = vsel %vm137_vm10, 1.0, %v883_v4  ;;  %vm700_vm10 = vcmask 31744  }
  0x97   :  { %v122_v26 = vpop.permute.xlu1 %121 }
  0x98   :  { %v124_v56 = vmul.f32 %v738_v47, %v122_v26  ;;  %v132_v58 = vmul.f32 %v739_v55, %v122_v26 }
  0x99   :  { %v156_v39 = vpop.permute.xlu0 %155 }
  0x9a   :  { %vm157_vm13 = vcmp.eq.s32.totalorder %v156_v39, %v1007_v33  ;;  %v125_v3 = vadd.f32 %v124_v56, %v105_v60  ;;  %v133_v7 = vadd.f32 %v132_v58, %v113_v1  ;;  %v463_v39 = vld [vmem:[%s1123_s8 + $0x8] sm:$0xff] }
  0x9b   :  { %v742_v63 = vsel %vm157_vm13, 1.0, %v883_v4  ;;  %vm716_vm13 = vcmask 523648  }
  0x9c   :  { %v148_v28 = vpop.permute.xlu1 %147 }
  0x9d   :  { %vm149_vm12 = vcmp.eq.s32.totalorder %v148_v28, %v1007_v33  ;;  %v378_v28 = vld [vmem:[%s1121_s6] sm:$0xff]  ;;  %s724_s6 = sshll.u32 %s895_s27, 4  ;;  %s725_s6 = int_to_ptr.vmem [resolvable:$true] %s724_s6 }
  0x9e   :  { %v176_v51 = vpop.permute.xlu0 %175  ;;  %v741_v61 = vsel %vm149_vm12, 1.0, %v883_v4  ;;  %vm711_vm12 = vcmask 392448   ;;  %p864_p1 = scmp.lt.s32.totalorder %s725_s6, %s725_s6 }
  0x9f   :  { %vm177_vm15 = vcmp.eq.s32.totalorder %v176_v51, %v1007_v33  ;;  %v582_v51 = vld [vmem:[%s1127_s12 + $0x8] sm:$0xff]  ;;  %s892_s12 = smov 96  }
  0xa0   :  { %v142_v30 = vpop.permute.xlu1 %141  ;;  %v744_v6 = vsel %vm177_vm15, 1.0, %v883_v4 }
  0xa1   :  { %v144_v62 = vmul.f32 %v740_v53, %v142_v30  ;;  %v152_v2 = vmul.f32 %v741_v61, %v142_v30 }
  0xa3   :  { %v196_v0 = vpop.permute.xlu0 %195  ;;  %v145_v10 = vadd.f32 %v144_v62, %v125_v3  ;;  %v153_v13 = vadd.f32 %v152_v2, %v133_v7 }
  0xa4   :  { %vm197_vm2 = vcmp.eq.s32.totalorder %v196_v0, %v1007_v33 }
  0xa5   :  { %v168_v34 = vpop.permute.xlu1 %167  ;;  %v746_v16 = vsel %vm197_vm2, 1.0, %v883_v4 }
  0xa6   :  { %vm169_vm14 = vcmp.eq.s32.totalorder %v168_v34, %v1007_v33 }
  0xa7   :  { %v743_v5 = vsel %vm169_vm14, 1.0, %v883_v4 }
  0xa9   :  { %v162_v36 = vpop.permute.xlu1 %161 }
  0xaa   :  { %v164_v8 = vmul.f32 %v742_v63, %v162_v36  ;;  %v172_v9 = vmul.f32 %v743_v5, %v162_v36 }
  0xac   :  { %v165_v17 = vadd.f32 %v164_v8, %v145_v10  ;;  %v173_v18 = vadd.f32 %v172_v9, %v153_v13 }
  0xae   :  { %v188_v48 = vpop.permute.xlu1 %187 }
  0xaf   :  { %vm189_vm0 = vcmp.eq.s32.totalorder %v188_v48, %v1007_v33  ;;  %v690_v48 = vld [vmem:[%s1118_s3] sm:$0xff] }
  0xb0   :  { %v745_v11 = vsel %vm189_vm0, 1.0, %v883_v4  ;;  %692 = vperm.xlu0 %848, %v690_v48  }
  0xb2   :  { %v182_v59 = vpop.permute.xlu1 %181 }
  0xb3   :  { %v184_v14 = vmul.f32 %v744_v6, %v182_v59  ;;  %v192_v15 = vmul.f32 %v745_v11, %v182_v59 }
  0xb5   :  { %v185_v21 = vadd.f32 %v184_v14, %v165_v17  ;;  %v193_v22 = vadd.f32 %v192_v15, %v173_v18 }
  0xb7   :  { %v208_v12 = vpop.permute.xlu1 %207 }
  0xb8   :  { %vm209_vm3 = vcmp.eq.s32.totalorder %v208_v12, %v1007_v33 }
  0xb9   :  { %v747_v19 = vsel %vm209_vm3, 1.0, %v883_v4 }
  0xbb   :  { %v202_v20 = vpop.permute.xlu1 %201 }
  0xbc   :  { %v204_v23 = vmul.f32 %v746_v16, %v202_v20  ;;  %v212_v24 = vmul.f32 %v747_v19, %v202_v20 }
  0xbe   :  { %v205_v25 = vadd.f32 %v204_v23, %v185_v21  ;;  %v213_v26 = vadd.f32 %v212_v24, %v193_v22 }
  0xc0   :  { %781 = vmatmul.mubr.msk.f32.vlgmr.msra.gmra.mxu0 %vm223_vm4, %v213_v26  ;;  %792 = vmatmul.mubr.msk.f32.vlgmr.msra.gmra.mxu1 %vm301_vm5, %v205_v25  ;;  %v758_v26 = vld [vmem:[%s1124_s9] ss:$0 sm:$0xff]  ;;  %s893_s9 = smov 8  }
  0xc1   :  { %798 = vmatprep.mubr.msk.f32.mxu0 %vm890_vm1, %v883_v4  ;;  %816 = vmatprep.mubr.msk.f32.mxu1 %vm890_vm1, %v883_v4 }
  0xc2   :  { %795 = vmatpush3.msra.mxu0 %v379_v27  ;;  %809 = vmatpush3.msra.mxu1 %v584_v49 }
  0xc3   :  { %796 = vmatprep.subr.mxu0 %v883_v4  ;;  %810 = vmatprep.subr.mxu1 %v883_v4 }
  0xc4   :  { %797 = vmatpush3.msra.mxu0 %v378_v28  ;;  %811 = vmatpush3.msra.mxu1 %v583_v50 }
  0xc5   :  { %801 = vmatprep.subr.mxu0 %v883_v4  ;;  %812 = vmatprep.subr.mxu1 %v883_v4 }
  0xc6   :  { %813 = vmatpush3.msra.mxu1 %v582_v51 }
  0xc7   :  { %814 = vmatprep.subr.mxu1 %v883_v4 }
  0xc8   :  { %815 = vmatpush3.msra.mxu1 %v581_v52 }
  0xd0   :  { %v217_v29 = vpop.xlane.xlu0 %216 }
  0xd1   :  { %v375_v30 = vmax.f32 %v217_v29, 1.0 }
  0xd3   :  { %849 = vrcp.f32 %v375_v30 }
  0xe0   :  { %v850_v31 = vpop.eup %849 }
 0x102   :  { %v567_v11 = vpop.permute.xlu1 %566 }
 0x106   :  { %v577_v14 = vpop.permute.xlu1 %576 }
 0x180   :  { %v297_v32 = vpop.f32.mrf.mxu0  ;;  %v371_v34 = vpop.f32.mrf.mxu1 }
 0x181   :  { %v372_v35 = vadd.f32 %v371_v34, %v297_v32 }
 0x182   :  { %v782_v36 = vpop.f32.mrf.mxu0  ;;  %v793_v37 = vpop.f32.mrf.mxu1 }
 0x183   :  { %v377_v38 = vmul.f32 %v850_v31, %v372_v35  ;;  %v693_v31 = vpop.permute.xlu0 %692 }
 0x184   :  { %vm694_vm9 = vcmp.eq.s32.totalorder %v1007_v33, %v693_v31 }
 0x185   :  { %799 = vmatmul.mubr.msk.f32.vlgmr.msra.gmra.mxu0 %vm387_vm6, %v377_v38  ;;  %v759_v32 = vsel %vm694_vm9, 1.0, %v883_v4  ;;  %v756_v38 = vld [vmem:[%s1128_s13] ss:$0 sm:$0xff]  ;;  %s859_s13 = scalar_lea.vmem %s725_s6, 128 }
 0x186   :  { %805 = vmatprep.mubr.msk.f32.mxu0 %vm890_vm1, %v883_v4  ;;  %802 = vmatpush3.msra.mxu0 %v463_v39  ;;  %vm537_vm1 = vcmask 523520   ;;  %v697_v34 = vmul.f32 0.35, %v759_v32  ;;  %p860_p0 = scmp.ne.s32.totalorder %s725_s6, %s859_s13  ;;  %p865_p2 = scmp.lt.s32.totalorder %s859_s13, %s859_s13 }
 0x187   :  { %803 = vmatprep.subr.mxu0 %v883_v4 }
 0x188   :  { %804 = vmatpush3.msra.mxu0 %v462_v40  ;;  %p866_p3 = por %p865_p2, %p864_p1 }
 0x18a   :  { %p867_p4 = pnand %p866_p3, %p860_p0 }
 0x245   :  { %v457_v44 = vpop.f32.mrf.mxu0 }
 0x246   :  { %v458_v45 = vadd.f32 %v751_v43, %v457_v44 }
 0x247   :  { %v800_v46 = vpop.f32.mrf.mxu0 }
 0x248   :  { %851 = vtanh.f32 %v458_v45 }
 0x255   :  { %v1075_v47 = vpop.eup %851 }
 0x256   :  { %806 = vmatmul.mubr.msk.f32.vlgmr.msra.gmra.mxu0 %vm387_vm6, %v1075_v47  ;;  %v667_v18 = vmul.f32 %v1075_v47, %v1075_v47 }
 0x258   :  { %v668_v19 = vsel %vm387_vm6, %v667_v18, 0.0 }
 0x316   :  { %v533_v53 = vpop.f32.mrf.mxu0 }
 0x317   :  { %v538_v54 = vsel %vm537_vm1, %v533_v53, 0.0 }
 0x318   :  { %v539_v55 = vrot.slane %v538_v54, 4  ;;  %v807_v56 = vpop.f32.mrf.mxu0 }
 0x31a   :  { %v540_v57 = vadd.f32 %v539_v55, %v538_v54 }
 0x31c   :  { %v541_v58 = vrot.slane %v540_v57, 2 }
 0x31e   :  { %v542_v59 = vadd.f32 %v541_v58, %v540_v57 }
 0x320   :  { %v543_v60 = vrot.slane %v542_v59, 1 }
 0x322   :  { %v544_v61 = vadd.f32 %v543_v60, %v542_v59 }
 0x324   :  { %v546_v62 = vmul.f32 0.125, %v544_v61 }
 0x326   :  { %v547_v63 = vsub.f32 %v533_v53, %v546_v62 }
 0x328   :  { %v548_v0 = vmul.f32 %v547_v63, %v547_v63 }
 0x32a   :  { %v549_v1 = vsel %vm537_vm1, %v548_v0, 0.0 }
 0x32b   :  { %v550_v2 = vrot.slane %v549_v1, 4 }
 0x32d   :  { %v551_v3 = vadd.f32 %v550_v2, %v549_v1 }
 0x32f   :  { %v552_v5 = vrot.slane %v551_v3, 2 }
 0x331   :  { %v553_v6 = vadd.f32 %v552_v5, %v551_v3 }
 0x333   :  { %v554_v7 = vrot.slane %v553_v6, 1 }
 0x335   :  { %v555_v8 = vadd.f32 %v554_v7, %v553_v6 }
 0x337   :  { %v556_v9 = vmul.f32 0.125, %v555_v8 }
 0x339   :  { %v557_v10 = vadd.f32 1e-05, %v556_v9 }
 0x33b   :  { %853 = vrsqrt.f32 %v557_v10 }
 0x348   :  { %v854_v12 = vpop.eup %853 }
 0x349   :  { %v559_v13 = vmul.f32 %v854_v12, %v547_v63 }
 0x34b   :  { %v569_v15 = vmul.f32 %v567_v11, %v559_v13 }
 0x34d   :  { %v579_v16 = vadd.f32 %v577_v14, %v569_v15 }
 0x34f   :  { %v580_v17 = vmax.f32 %v579_v16, 0.0 }
 0x351   :  { %593 = vrot.lane.b32.xlu1 %v580_v17, %s892_s12 }
 0x375   :  { %669 = vadd.xlane.f32.xlu1 %v668_v19 }
 0x386   :  { %708 = vrot.lane.b32.xlu1 %v1075_v47, %s891_s0 }
 0x3c3   :  { %v594_v20 = vpop.permute.xlu1 %593 }
 0x3c4   :  { %817 = vmatmul.mubr.msk.f32.vlgmr.msra.gmra.mxu1 %vm301_vm5, %v594_v20 }
 0x3fe   :  { %v670_v21 = vpop.xlane.xlu1 %669 }
 0x3ff   :  { %v671_v22 = vmul.f32 2.0, %v670_v21 }
 0x401   :  { %855 = vrsqrt.f32 %v671_v22  ;;  %vm674_vm7 = vcmp.eq.f32.partialorder %v671_v22, inf  ;;  %v677_v25 = vand.u32 2147483648, %v671_v22  ;;  %vm676_vm8 = vcmp.eq.f32.partialorder %v671_v22, 0.0 }
 0x402   :  { %v709_v33 = vpop.permute.xlu1 %708 }
 0x40e   :  { %v856_v23 = vpop.eup %855 }
 0x40f   :  { %v673_v24 = vmul.f32 %v856_v23, %v671_v22 }
 0x411   :  { %v675_v27 = vsel %vm674_vm7, %v671_v22, %v673_v24 }
 0x412   :  { %v678_v28 = vsel %vm676_vm8, %v677_v25, %v675_v27 }
 0x413   :  { %v686_v29 = vmul.f32 %v758_v26, %v678_v28 }
 0x415   :  { %v687_v30 = vmax.f32 %v686_v29, 1e-08 }
 0x417   :  { %857 = vrcp.f32 %v687_v30 }
 0x424   :  { %v858_v35 = vpop.eup %857 }
 0x425   :  { %v689_v36 = vmul.f32 %v858_v35, %v533_v53 }
 0x427   :  { %v698_v37 = vsub.f32 %v689_v36, %v697_v34 }
 0x429   :  { %701 = vst.msk [vmem:[#allocation2] sm:$0xff] %vm700_vm10, %v698_v37 }
 0x484   :  { %v663_v39 = vpop.f32.mrf.mxu1 }
 0x485   :  { %v664_v40 = vadd.f32 %v756_v38, %v663_v39 }
 0x486   :  { %v818_v41 = vpop.f32.mrf.mxu1 }
 0x487   :  { %703 = vrot.lane.b32.xlu1 %v664_v40, %s893_s9 }
 0x48b   :  { %713 = vrot.lane.b32.xlu1 %v1075_v47, %s894_s26 }
 0x4f9   :  { %v704_v4 = vpop.permute.xlu1 %703 }
 0x4fa   :  { %707 = vst.msk [vmem:[#allocation2] sm:$0xff] %vm706_vm11, %v704_v4 }
 0x4fb   :  { %712 = vst.msk [vmem:[#allocation2] sm:$0xff] %vm711_vm12, %v709_v33 }
 0x4fd   :  { %v714_v42 = vpop.permute.xlu1 %713 }
 0x4fe   :  { %717 = vst.msk [vmem:[#allocation2] sm:$0xff] %vm716_vm13, %v714_v42 }
 0x4ff   :  { %870 = shalt.err (!%p867_p4)
}
 0x500   :  { %727 = dma.vmem_to_hbm [thread:$0]  %s725_s6, 128, %s1129_s14, [#allocation3]  }
 0x501   :  { %879 = dma.done.wait [#allocation3], 128  }
 0x502   :  { %880 = vsyncadd [#allocation3], 4294967168 }
 0x503   :  { %731 = vsyncpa [#allocation3], 1 }

</bundles_post_ra>
